<compile_context>
chip_gen: v6e
topology: v6e:2x2x1
jax: 0.10.0
libtpu: 0.0.40
codegen_flags: <defaults>
</compile_context>

<pallas_src>
import functools

import jax
import jax.numpy as jnp
from jax.experimental import pallas as pl
from jax.experimental.pallas import tpu as pltpu


def _round_up(n, m):
    return ((n + m - 1) // m) * m


# ---------------------------------------------------------------------------
# Kernel
# ---------------------------------------------------------------------------
def _decoder_kernel(z_ref, w1_ref, b1_ref, w2_ref, b2_ref, w3_ref, b3_ref,
                    out_ref):
    w1 = w1_ref[...]
    cdt = w1.dtype                      # MXU compute dtype (f32 or bf16)

    z = z_ref[...].astype(cdt)
    h = jnp.dot(z, w1, preferred_element_type=jnp.float32) + b1_ref[...]
    h = jnp.maximum(h, 0.0)
    h = jnp.dot(h.astype(cdt), w2_ref[...],
                preferred_element_type=jnp.float32) + b2_ref[...]
    h = jnp.maximum(h, 0.0)
    y = jnp.dot(h.astype(cdt), w3_ref[...],
                preferred_element_type=jnp.float32) + b3_ref[...]

    # Single lane-dense (multiple-of-128) store; concat([x_pred, c_pred]) is
    # implicit via the block-diagonal W3f.
    out_ref[...] = y.astype(out_ref.dtype)


# ---------------------------------------------------------------------------
# One-time (init-time) weight fusion — NOT on the per-call path.
# ---------------------------------------------------------------------------
def fuse_params(params, *, compute_dtype=jnp.float32, lane=128):
    """Fuse the two branches into one MLP with a lane-padded last layer."""
    p = params
    H = p["w1x"].shape[1]
    x_dim = p["w3x"].shape[1]
    c_dim = p["w3c"].shape[1]
    out_dim = x_dim + c_dim
    out_pad = _round_up(out_dim, lane)

    w1 = jnp.concatenate([p["w1x"], p["w1c"]], axis=1).astype(compute_dtype)
    b1 = jnp.concatenate([p["b1x"], p["b1c"]], axis=1).astype(jnp.float32)

    z_hh = jnp.zeros((H, H), p["w2x"].dtype)
    w2 = jnp.block([[p["w2x"], z_hh],
                    [z_hh, p["w2c"]]]).astype(compute_dtype)
    b2 = jnp.concatenate([p["b2x"], p["b2c"]], axis=1).astype(jnp.float32)

    w3 = jnp.zeros((2 * H, out_pad), jnp.float32)
    w3 = w3.at[:H, :x_dim].set(p["w3x"])
    w3 = w3.at[H:, x_dim:out_dim].set(p["w3c"])
    w3 = w3.astype(compute_dtype)
    b3 = jnp.zeros((1, out_pad), jnp.float32)
    b3 = b3.at[:, :x_dim].set(p["b3x"])
    b3 = b3.at[:, x_dim:out_dim].set(p["b3c"])

    return {"w1": w1, "b1": b1, "w2": w2, "b2": b2, "w3": w3, "b3": b3,
            "out_dim": out_dim}


# ---------------------------------------------------------------------------
# Wrapper
# ---------------------------------------------------------------------------
def observation_decoder_forward(z, fused, *, batch_tile=4096,
                                return_padded=False):
    """z: [B, z_dim] float.  fused: output of fuse_params (init-time)."""
    w1, b1 = fused["w1"], fused["b1"]
    w2, b2 = fused["w2"], fused["b2"]
    w3, b3 = fused["w3"], fused["b3"]
    out_dim = fused["out_dim"]

    B, z_dim = z.shape
    two_h = w1.shape[1]
    out_pad = w3.shape[1]

    batch_tile = max(8, _round_up(batch_tile, 8))
    if B > batch_tile:
        # At least 4 grid steps (keeps both v7x TensorCores busy), capped by
        # the requested tile size; always a multiple of 8.
        tm = min(batch_tile, _round_up(pl.cdiv(B, 4), 8))
    elif B >= 2048:
        # Big enough to amortize per-step overhead: split into 2 steps so
        # dimension_semantics=("parallel",) can shard across v7x's 2 TCs.
        tm = _round_up(pl.cdiv(B, 2), 8)
    else:
        # Single full-array block (block dims equal to array dims are legal
        # regardless of the (8,128) divisibility rule).
        tm = B
    grid = (pl.cdiv(B, tm),)   # partial last block handled by Pallas (no pad)

    def row_map(i):
        return (i, 0)

    def const_map(i):
        return (0, 0)

    in_specs = [
        pl.BlockSpec((tm, z_dim), row_map),          # z: tiled over batch
        pl.BlockSpec((z_dim, two_h), const_map),     # W1f (VMEM-resident)
        pl.BlockSpec((1, two_h), const_map),         # b1f
        pl.BlockSpec((two_h, two_h), const_map),     # W2f
        pl.BlockSpec((1, two_h), const_map),         # b2f
        pl.BlockSpec((two_h, out_pad), const_map),   # W3f (lane-padded)
        pl.BlockSpec((1, out_pad), const_map),       # b3f
    ]
    out_spec = pl.BlockSpec((tm, out_pad), row_map)

    flops = 2 * B * (z_dim * two_h + two_h * two_h + two_h * out_pad)
    bytes_accessed = int(
        z.size * z.dtype.itemsize
        + B * out_pad * 4
        + sum(a.size * a.dtype.itemsize for a in (w1, b1, w2, b2, w3, b3)))

    out = pl.pallas_call(
        _decoder_kernel,
        out_shape=jax.ShapeDtypeStruct((B, out_pad), jnp.float32),
        grid=grid,
        in_specs=in_specs,
        out_specs=out_spec,
        compiler_params=pltpu.CompilerParams(
            dimension_semantics=("parallel",)),
        cost_estimate=pl.CostEstimate(
            flops=flops, transcendentals=0, bytes_accessed=bytes_accessed),
    )(z, w1, b1, w2, b2, w3, b3)

    if return_padded or out_pad == out_dim:
        return out
    # Consumers that can handle the lane-padded slab should pass
    # return_padded=True to avoid this extra slice.
    return out[:, :out_dim]


# ---------------------------------------------------------------------------
# Parameter init (PyTorch-like uniform fan-in scaling) + pure-JAX reference
# ---------------------------------------------------------------------------
def init_params(key, z_dim, hidden_dim, x_dim, c_dim):
    def linear(k, fan_in, fan_out):
        kw, kb = jax.random.split(k)
        bound = 1.0 / jnp.sqrt(fan_in)
        w = jax.random.uniform(kw, (fan_in, fan_out), jnp.float32, -bound, bound)
        b = jax.random.uniform(kb, (1, fan_out), jnp.float32, -bound, bound)
        return w, b

    keys = jax.random.split(key, 6)
    p = {}
    p["w1x"], p["b1x"] = linear(keys[0], z_dim, hidden_dim)
    p["w2x"], p["b2x"] = linear(keys[1], hidden_dim, hidden_dim)
    p["w3x"], p["b3x"] = linear(keys[2], hidden_dim, x_dim)
    p["w1c"], p["b1c"] = linear(keys[3], z_dim, hidden_dim)
    p["w2c"], p["b2c"] = linear(keys[4], hidden_dim, hidden_dim)
    p["w3c"], p["b3c"] = linear(keys[5], hidden_dim, c_dim)
    return p


def _reference_forward(z, p):
    def mlp(x, w1, b1, w2, b2, w3, b3):
        h = jnp.maximum(x @ w1 + b1, 0.0)
        h = jnp.maximum(h @ w2 + b2, 0.0)
        return h @ w3 + b3
    x_pred = mlp(z, p["w1x"], p["b1x"], p["w2x"], p["b2x"], p["w3x"], p["b3x"])
    c_pred = mlp(z, p["w1c"], p["b1c"], p["w2c"], p["b2c"], p["w3c"], p["b3c"])
    return jnp.concatenate([x_pred, c_pred], axis=1)


# TODO(synk): loglik/loss (BCE + Normal log-prob with softplus(noise_sd)) are not
# part of forward(); not implemented here.

if __name__ == "__main__":
    # Small shapes consistent with the module's forward: z is [batch, z_dim].
    batch, z_dim, hidden_dim, x_dim, c_dim = 2, 8, 32, 16, 4

    key = jax.random.PRNGKey(0)
    k_z, k_p = jax.random.split(key)
    z = jax.random.normal(k_z, (batch, z_dim), dtype=jnp.float32)
    params = init_params(k_p, z_dim, hidden_dim, x_dim, c_dim)
    ref = _reference_forward(z, params)

    # --- f32 MXU path: exact vs reference --------------------------------
    fused_f32 = fuse_params(params, compute_dtype=jnp.float32)
    out = jax.block_until_ready(observation_decoder_forward(z, fused_f32))
    assert out.shape == (batch, x_dim + c_dim)
    assert jnp.allclose(out, ref, atol=1e-5, rtol=1e-5)

    # --- bf16 MXU path (recommended on v6e/v7x): f32 accumulate/elementwise
    fused_bf16 = fuse_params(params, compute_dtype=jnp.bfloat16)
    out_bf = jax.block_until_ready(observation_decoder_forward(z, fused_bf16))
    assert out_bf.shape == (batch, x_dim + c_dim)
    assert jnp.allclose(out_bf, ref, atol=7.5e-2, rtol=7.5e-2)

    # --- batch-gridded path with a partial last block (no pad/slice) ------
    big_b = 1031  # deliberately not a multiple of the tile
    zb = jax.random.normal(jax.random.PRNGKey(1), (big_b, z_dim), jnp.float32)
    refb = _reference_forward(zb, params)
    outb = jax.block_until_ready(
        observation_decoder_forward(zb, fused_f32, batch_tile=256))
    assert outb.shape == (big_b, x_dim + c_dim)
    assert jnp.allclose(outb, refb, atol=1e-4, rtol=1e-4)

    # --- mid-size batch: 2 grid steps so v7x's two TCs split the work -----
    mid_b = 2500
    zm = jax.random.normal(jax.random.PRNGKey(2), (mid_b, z_dim), jnp.float32)
    outm = jax.block_until_ready(observation_decoder_forward(zm, fused_f32))
    assert jnp.allclose(outm, _reference_forward(zm, params),
                        atol=1e-4, rtol=1e-4)

    print("KERNEL_OK")
</pallas_src>

<mosaic_0001>
module attributes {stable_mosaic.version = 11 : i64} {
  func.func @_decoder_kernel(%arg0: i32, %arg1: memref<2x8xf32, #tpu.memory_space<vmem>>, %arg2: memref<8x64xf32, #tpu.memory_space<vmem>>, %arg3: memref<1x64xf32, #tpu.memory_space<vmem>>, %arg4: memref<64x64xf32, #tpu.memory_space<vmem>>, %arg5: memref<1x64xf32, #tpu.memory_space<vmem>>, %arg6: memref<64x128xf32, #tpu.memory_space<vmem>>, %arg7: memref<1x128xf32, #tpu.memory_space<vmem>>, %arg8: memref<2x128xf32, #tpu.memory_space<vmem>>) attributes {dimension_semantics = [#tpu.dimension_semantics<parallel>], iteration_bounds = array<i64: 1>, scalar_prefetch = 0 : i64, scratch_operands = 0 : i64, tpu.core_type = #tpu.core_type<tc>, window_params = [{transform_indices = @transform_0, window_bounds = array<i64: 2, 8>}, {pipeline_mode = #tpu.pipeline_mode<synchronous>, transform_indices = @transform_1, window_bounds = array<i64: 8, 64>}, {pipeline_mode = #tpu.pipeline_mode<synchronous>, transform_indices = @transform_2, window_bounds = array<i64: 1, 64>}, {pipeline_mode = #tpu.pipeline_mode<synchronous>, transform_indices = @transform_3, window_bounds = array<i64: 64, 64>}, {pipeline_mode = #tpu.pipeline_mode<synchronous>, transform_indices = @transform_4, window_bounds = array<i64: 1, 64>}, {pipeline_mode = #tpu.pipeline_mode<synchronous>, transform_indices = @transform_5, window_bounds = array<i64: 64, 128>}, {pipeline_mode = #tpu.pipeline_mode<synchronous>, transform_indices = @transform_6, window_bounds = array<i64: 1, 128>}, {transform_indices = @transform_7, window_bounds = array<i64: 2, 128>}]} {
    %c0 = arith.constant 0 : index
    %c0_0 = arith.constant 0 : index
    %0 = vector.load %arg2[%c0, %c0_0] : memref<8x64xf32, #tpu.memory_space<vmem>>, vector<8x64xf32>
    %c0_1 = arith.constant 0 : index
    %c0_2 = arith.constant 0 : index
    %1 = vector.load %arg1[%c0_1, %c0_2] : memref<2x8xf32, #tpu.memory_space<vmem>>, vector<2x8xf32>
    %cst = arith.constant dense<0.000000e+00> : vector<2x64xf32>
    %2 = tpu.matmul %1, %0, %cst {dimension_numbers = #tpu.dot_dimension_numbers<[1], [0], [0], [1], [0, 0, 1, 1], [], []>} : vector<2x8xf32>, vector<8x64xf32>, vector<2x64xf32> -> vector<2x64xf32>
    %c0_3 = arith.constant 0 : index
    %c0_4 = arith.constant 0 : index
    %3 = vector.load %arg3[%c0_3, %c0_4] : memref<1x64xf32, #tpu.memory_space<vmem>>, vector<1x64xf32>
    %4 = vector.broadcast %3 : vector<1x64xf32> to vector<2x64xf32>
    %5 = arith.addf %2, %4 : vector<2x64xf32>
    %cst_5 = arith.constant 0.000000e+00 : f32
    %6 = vector.broadcast %cst_5 : f32 to vector<2x64xf32>
    %7 = arith.maximumf %5, %6 : vector<2x64xf32>
    %c0_6 = arith.constant 0 : index
    %c0_7 = arith.constant 0 : index
    %8 = vector.load %arg4[%c0_6, %c0_7] : memref<64x64xf32, #tpu.memory_space<vmem>>, vector<64x64xf32>
    %cst_8 = arith.constant dense<0.000000e+00> : vector<2x64xf32>
    %9 = tpu.matmul %7, %8, %cst_8 {dimension_numbers = #tpu.dot_dimension_numbers<[1], [0], [0], [1], [0, 0, 1, 1], [], []>} : vector<2x64xf32>, vector<64x64xf32>, vector<2x64xf32> -> vector<2x64xf32>
    %c0_9 = arith.constant 0 : index
    %c0_10 = arith.constant 0 : index
    %10 = vector.load %arg5[%c0_9, %c0_10] : memref<1x64xf32, #tpu.memory_space<vmem>>, vector<1x64xf32>
    %11 = vector.broadcast %10 : vector<1x64xf32> to vector<2x64xf32>
    %12 = arith.addf %9, %11 : vector<2x64xf32>
    %cst_11 = arith.constant 0.000000e+00 : f32
    %13 = vector.broadcast %cst_11 : f32 to vector<2x64xf32>
    %14 = arith.maximumf %12, %13 : vector<2x64xf32>
    %c0_12 = arith.constant 0 : index
    %c0_13 = arith.constant 0 : index
    %15 = vector.load %arg6[%c0_12, %c0_13] : memref<64x128xf32, #tpu.memory_space<vmem>>, vector<64x128xf32>
    %cst_14 = arith.constant dense<0.000000e+00> : vector<2x128xf32>
    %16 = tpu.matmul %14, %15, %cst_14 {dimension_numbers = #tpu.dot_dimension_numbers<[1], [0], [0], [1], [0, 0, 1, 1], [], []>} : vector<2x64xf32>, vector<64x128xf32>, vector<2x128xf32> -> vector<2x128xf32>
    %c0_15 = arith.constant 0 : index
    %c0_16 = arith.constant 0 : index
    %17 = vector.load %arg7[%c0_15, %c0_16] : memref<1x128xf32, #tpu.memory_space<vmem>>, vector<1x128xf32>
    %18 = vector.broadcast %17 : vector<1x128xf32> to vector<2x128xf32>
    %19 = arith.addf %16, %18 : vector<2x128xf32>
    %c0_17 = arith.constant 0 : index
    %c0_18 = arith.constant 0 : index
    %20 = vector.load %arg8[%c0_17, %c0_18] : memref<2x128xf32, #tpu.memory_space<vmem>>, vector<2x128xf32>
    tpu.vector_store %arg8[%c0_17, %c0_18], %19 {strides = array<i32>} : memref<2x128xf32, #tpu.memory_space<vmem>>, vector<2x128xf32>,
    return
  }
  func.func @transform_0(%arg0: i32) -> (i32, i32) {
    %c0_i32 = arith.constant 0 : i32
    %c0_i32_0 = arith.constant 0 : i32
    return %arg0, %c0_i32 : i32, i32
  }
  func.func @transform_1(%arg0: i32) -> (i32, i32) {
    %c0_i32 = arith.constant 0 : i32
    %c0_i32_0 = arith.constant 0 : i32
    %c0_i32_1 = arith.constant 0 : i32
    return %c0_i32, %c0_i32_0 : i32, i32
  }
  func.func @transform_2(%arg0: i32) -> (i32, i32) {
    %c0_i32 = arith.constant 0 : i32
    %c0_i32_0 = arith.constant 0 : i32
    %c0_i32_1 = arith.constant 0 : i32
    return %c0_i32, %c0_i32_0 : i32, i32
  }
  func.func @transform_3(%arg0: i32) -> (i32, i32) {
    %c0_i32 = arith.constant 0 : i32
    %c0_i32_0 = arith.constant 0 : i32
    %c0_i32_1 = arith.constant 0 : i32
    return %c0_i32, %c0_i32_0 : i32, i32
  }
  func.func @transform_4(%arg0: i32) -> (i32, i32) {
    %c0_i32 = arith.constant 0 : i32
    %c0_i32_0 = arith.constant 0 : i32
    %c0_i32_1 = arith.constant 0 : i32
    return %c0_i32, %c0_i32_0 : i32, i32
  }
  func.func @transform_5(%arg0: i32) -> (i32, i32) {
    %c0_i32 = arith.constant 0 : i32
    %c0_i32_0 = arith.constant 0 : i32
    %c0_i32_1 = arith.constant 0 : i32
    return %c0_i32, %c0_i32_0 : i32, i32
  }
  func.func @transform_6(%arg0: i32) -> (i32, i32) {
    %c0_i32 = arith.constant 0 : i32
    %c0_i32_0 = arith.constant 0 : i32
    %c0_i32_1 = arith.constant 0 : i32
    return %c0_i32, %c0_i32_0 : i32, i32
  }
  func.func @transform_7(%arg0: i32) -> (i32, i32) {
    %c0_i32 = arith.constant 0 : i32
    %c0_i32_0 = arith.constant 0 : i32
    return %arg0, %c0_i32 : i32, i32
  }
}

</mosaic_0001>

<bundles_post_ra>
// kernel: tpu_custom_call.1
= control target key start
LH: loop header
LB: loop body
LE: loop exit
PB: predicated region body
PF: predicated region fallthrough
CT: control target
= control target key end

     0   :  { %12 = vsyncpa [#allocation3], 0  ;;  %s622_s0 = inlined_call_operand.hbm [shape: f32[2,8], index: 0, kind: input, shape index: {}]   ;;  %s623_s1 = inlined_call_operand.hbm [shape: f32[8,64], index: 1, kind: input, shape index: {}]   ;;  %s624_s2 = inlined_call_operand.vmem [shape: f32[1,64], index: 2, kind: input, shape index: {}]   ;;  %s625_s3 = inlined_call_operand.hbm [shape: f32[64,64], index: 3, kind: input, shape index: {}]   ;;  %s626_s4 = inlined_call_operand.vmem [shape: f32[1,64], index: 4, kind: input, shape index: {}]   ;;  %s627_s5 = inlined_call_operand.hbm [shape: f32[64,128], index: 5, kind: input, shape index: {}]   ;;  %s628_s6 = inlined_call_operand.vmem [shape: f32[1,128], index: 6, kind: input, shape index: {}]   ;;  %s629_s7 = inlined_call_operand.hbm [shape: f32[2,128], index: 7, kind: output, shape index: {}]  }
   0x1   :  { %13 = vsyncpa [#allocation6], 0 }
   0x2   :  { %14 = vsyncpa [#allocation9], 0 }
   0x3   :  { %15 = vsyncpa [#allocation4], 0  ;;  %s544_s24 = smov [#allocation5]   ;;  %s545_s26 = smov [#allocation2]  }
   0x4   :  { %s32_s25 = sshll.u32 %s544_s24, 4  ;;  %s22_s27 = sshll.u32 %s545_s26, 4  ;;  %s33_s25 = int_to_ptr.vmem [resolvable:$true] %s32_s25  ;;  %s23_s27 = int_to_ptr.vmem [resolvable:$true] %s22_s27 }
   0x5   :  { %s444_s28 = scalar_lea.vmem %s33_s25, 128  ;;  %p449_p1 = scmp.lt.s32.totalorder %s33_s25, %s33_s25 }
   0x6   :  { %p445_p0 = scmp.ne.s32.totalorder %s33_s25, %s444_s28  ;;  %p450_p2 = scmp.lt.s32.totalorder %s444_s28, %s444_s28 }
   0x8   :  { %p451_p3 = por %p450_p2, %p449_p1 }
   0xa   :  { %p452_p4 = pnand %p451_p3, %p445_p0 }
   0xc   :  { %455 = shalt.err (!%p452_p4)
}
   0xd   :  { %35 = dma.hbm_to_vmem [thread:$0]  %s623_s1, 128, %s33_s25, [#allocation6]  }
   0xe   :  { %s464_s8 = scalar_lea.vmem %s23_s27, 32  ;;  %p469_p6 = scmp.lt.s32.totalorder %s23_s27, %s23_s27 }
   0xf   :  { %p465_p5 = scmp.ne.s32.totalorder %s23_s27, %s464_s8  ;;  %p470_p7 = scmp.lt.s32.totalorder %s464_s8, %s464_s8 }
  0x11   :  { %p471_p8 = por %p470_p7, %p469_p6 }
  0x13   :  { %p472_p9 = pnand %p471_p8, %p465_p5 }
  0x15   :  { %475 = shalt.err (!%p472_p9)
}
  0x16   :  { %25 = dma.hbm_to_vmem [thread:$0]  %s622_s0, 32, %s23_s27, [#allocation3]  }
  0x17   :  { %s546_s11 = smov [#allocation7]  }
  0x18   :  { %s43_s12 = sshll.u32 %s546_s11, 4  ;;  %s44_s12 = int_to_ptr.vmem [resolvable:$true] %s43_s12 }
  0x19   :  { %s484_s13 = scalar_lea.vmem %s44_s12, 1024  ;;  %p489_p11 = scmp.lt.s32.totalorder %s44_s12, %s44_s12 }
  0x1a   :  { %p485_p10 = scmp.ne.s32.totalorder %s44_s12, %s484_s13  ;;  %p490_p12 = scmp.lt.s32.totalorder %s484_s13, %s484_s13 }
  0x1c   :  { %p491_p13 = por %p490_p12, %p489_p11 }
  0x1e   :  { %p492_p0 = pnand %p491_p13, %p485_p10 }
  0x20   :  { %495 = shalt.err (!%p492_p0)
}
  0x21   :  { %s547_s1 = smov 128   ;;  %s548_s14 = smov 8  }
  0x22   :  { %49 = dma.hbm_to_vmem [thread:$0]  %s625_s3, 1024, %s44_s12, [#allocation6], %s547_s1, %s547_s1, %s548_s14  }
  0x23   :  { %s549_s17 = smov [#allocation8]  }
  0x24   :  { %s57_s18 = sshll.u32 %s549_s17, 4  ;;  %s58_s18 = int_to_ptr.vmem [resolvable:$true] %s57_s18 }
  0x25   :  { %s504_s0 = scalar_lea.vmem %s58_s18, 1024  ;;  %p509_p2 = scmp.lt.s32.totalorder %s58_s18, %s58_s18 }
  0x26   :  { %p505_p1 = scmp.ne.s32.totalorder %s58_s18, %s504_s0  ;;  %p510_p3 = scmp.lt.s32.totalorder %s504_s0, %s504_s0 }
  0x28   :  { %p511_p4 = por %p510_p3, %p509_p2 }
  0x2a   :  { %p512_p5 = pnand %p511_p4, %p505_p1 }
  0x2c   :  { %515 = shalt.err (!%p512_p5)
}
  0x2d   :  { %63 = dma.hbm_to_vmem [thread:$0]  %s627_s5, 1024, %s58_s18, [#allocation9], %s547_s1, %s547_s1, %s548_s14  }
  0x2e   :  { %536 = dma.done.wait [#allocation3], 32  }
  0x2f   :  { %537 = vsyncadd [#allocation3], 4294967264 }
  0x30   :  { %538 = dma.done.wait [#allocation6], 1152  }
  0x31   :  { %539 = vsyncadd [#allocation6], 4294966144 }
  0x32   :  { %540 = dma.done.wait [#allocation9], 1024  }
  0x33   :  { %541 = vsyncadd [#allocation9], 4294966272  ;;  %v550_v0 = vmov 0.0   ;;  %vm551_vm0 = vmmov 0   ;;  %vm87_vm1 = vcmask 64512   ;;  %v78_v1 = vld [vmem:[#allocation5] sm:$0xff] }
  0x34   :  { %384 = vmatprep.subr.mxu0 %v550_v0  ;;  %386 = vmatprep.mubr.msk.f32.mxu0 %vm551_vm0, %v550_v0  ;;  %v79_v2 = vld [vmem:[#allocation2] sm:$0x3]  ;;  %v169_v3 = vld [vmem:[#allocation7 + $0x38] sm:$0xff]  ;;  %v167_v5 = vld [vmem:[#allocation7 + $0x28] sm:$0xff]  ;;  %vm177_vm2 = vcmask 523264   ;;  %s552_s24 = smov [#allocation10]  }
  0x35   :  { %389 = vmatprep.subr.mxu1 %v550_v0  ;;  %405 = vmatprep.mubr.msk.f32.mxu1 %vm551_vm0, %v550_v0  ;;  %v168_v4 = vld [vmem:[#allocation7 + $0x30] sm:$0xff]  ;;  %v166_v6 = vld [vmem:[#allocation7 + $0x20] sm:$0xff]  ;;  %v165_v7 = vld [vmem:[#allocation7 + $0x18] sm:$0xff]  ;;  %s347_s25 = sshll.u32 %s552_s24, 4  ;;  %s348_s25 = int_to_ptr.vmem [resolvable:$true] %s347_s25 }
  0x36   :  { %385 = vmatpush3.msra.mxu0 %v78_v1  ;;  %390 = vmatpush3.msra.mxu1 %v169_v3  ;;  %v164_v8 = vld [vmem:[#allocation7 + $0x10] sm:$0xff]  ;;  %v163_v9 = vld [vmem:[#allocation7 + $0x8] sm:$0xff]  ;;  %v162_v10 = vld [vmem:[#allocation7] sm:$0xff]  ;;  %s516_s26 = scalar_lea.vmem %s348_s25, 32  ;;  %p521_p7 = scmp.lt.s32.totalorder %s348_s25, %s348_s25 }
  0x37   :  { %387 = vmatmul.mubr.msk.f32.vlgmr.msra.gmra.mxu0 %vm87_vm1, %v79_v2  ;;  %391 = vmatprep.subr.mxu1 %v550_v0  ;;  %v259_v11 = vld [vmem:[#allocation8 + $0x38] sm:$0xff]  ;;  %v258_v12 = vld [vmem:[#allocation8 + $0x30] sm:$0xff]  ;;  %v257_v13 = vld [vmem:[#allocation8 + $0x28] sm:$0xff]  ;;  %p517_p6 = scmp.ne.s32.totalorder %s348_s25, %s516_s26  ;;  %p522_p8 = scmp.lt.s32.totalorder %s516_s26, %s516_s26 }
  0x38   :  { %392 = vmatpush3.msra.mxu1 %v168_v4  ;;  %408 = vmatprep.subr.mxu0 %v550_v0  ;;  %v256_v14 = vld [vmem:[#allocation8 + $0x20] sm:$0xff]  ;;  %v255_v15 = vld [vmem:[#allocation8 + $0x18] sm:$0xff]  ;;  %v358_v16 = vld [vmem:[%s624_s2] ss:$0 sm:$0xff] }
  0x39   :  { %393 = vmatprep.subr.mxu1 %v550_v0  ;;  %424 = vmatprep.mubr.msk.f32.mxu0 %vm551_vm0, %v550_v0  ;;  %v254_v21 = vld [vmem:[#allocation8 + $0x10] sm:$0xff]  ;;  %v253_v22 = vld [vmem:[#allocation8 + $0x8] sm:$0xff]  ;;  %v252_v23 = vld [vmem:[#allocation8] sm:$0xff]  ;;  %p523_p9 = por %p522_p8, %p521_p7 }
  0x3a   :  { %394 = vmatpush3.msra.mxu1 %v167_v5  ;;  %409 = vmatpush3.msra.mxu0 %v259_v11  ;;  %v360_v24 = vld [vmem:[%s626_s4] ss:$0 sm:$0xff] }
  0x3b   :  { %395 = vmatprep.subr.mxu1 %v550_v0  ;;  %410 = vmatprep.subr.mxu0 %v550_v0  ;;  %v362_v29 = vld [vmem:[%s628_s6] ss:$0 sm:$0xff]  ;;  %p524_p10 = pnand %p523_p9, %p517_p6 }
  0x3c   :  { %396 = vmatpush3.msra.mxu1 %v166_v6  ;;  %411 = vmatpush3.msra.mxu0 %v258_v12 }
  0x3d   :  { %397 = vmatprep.subr.mxu1 %v550_v0  ;;  %412 = vmatprep.subr.mxu0 %v550_v0 }
  0x3e   :  { %398 = vmatpush3.msra.mxu1 %v165_v7  ;;  %413 = vmatpush3.msra.mxu0 %v257_v13 }
  0x3f   :  { %399 = vmatprep.subr.mxu1 %v550_v0  ;;  %414 = vmatprep.subr.mxu0 %v550_v0 }
  0x40   :  { %400 = vmatpush3.msra.mxu1 %v164_v8  ;;  %415 = vmatpush3.msra.mxu0 %v256_v14 }
  0x41   :  { %401 = vmatprep.subr.mxu1 %v550_v0  ;;  %416 = vmatprep.subr.mxu0 %v550_v0 }
  0x42   :  { %402 = vmatpush3.msra.mxu1 %v163_v9  ;;  %417 = vmatpush3.msra.mxu0 %v255_v15 }
  0x43   :  { %403 = vmatprep.subr.mxu1 %v550_v0  ;;  %418 = vmatprep.subr.mxu0 %v550_v0 }
  0x44   :  { %404 = vmatpush3.msra.mxu1 %v162_v10  ;;  %419 = vmatpush3.msra.mxu0 %v254_v21 }
  0x45   :  { %420 = vmatprep.subr.mxu0 %v550_v0 }
  0x46   :  { %421 = vmatpush3.msra.mxu0 %v253_v22 }
  0x47   :  { %422 = vmatprep.subr.mxu0 %v550_v0 }
  0x48   :  { %423 = vmatpush3.msra.mxu0 %v252_v23 }
  0xf7   :  { %v157_v17 = vpop.f32.mrf.mxu0 }
  0xf8   :  { %v158_v18 = vadd.f32 %v358_v16, %v157_v17 }
  0xf9   :  { %v388_v19 = vpop.f32.mrf.mxu0 }
  0xfa   :  { %v161_v20 = vmax.f32 %v158_v18, 0.0 }
  0xfc   :  { %406 = vmatmul.mubr.msk.f32.vlgmr.msra.gmra.mxu1 %vm177_vm2, %v161_v20 }
 0x1bc   :  { %v247_v25 = vpop.f32.mrf.mxu1 }
 0x1bd   :  { %v248_v26 = vadd.f32 %v360_v24, %v247_v25 }
 0x1be   :  { %v407_v27 = vpop.f32.mrf.mxu1 }
 0x1bf   :  { %v251_v28 = vmax.f32 %v248_v26, 0.0 }
 0x1c1   :  { %425 = vmatmul.mubr.msk.f32.vlgmr.msra.gmra.mxu0 %vm177_vm2, %v251_v28 }
 0x281   :  { %v336_v30 = vpop.f32.mrf.mxu0 }
 0x282   :  { %v337_v31 = vadd.f32 %v362_v29, %v336_v30 }
 0x283   :  { %v426_v32 = vpop.f32.mrf.mxu0 }
 0x284   :  { %340 = vst [vmem:[#allocation10] sm:$0x3] %v337_v31 }
 0x285   :  { %527 = shalt.err (!%p524_p10)
}
 0x286   :  { %350 = dma.vmem_to_hbm [thread:$0]  %s348_s25, 32, %s629_s7, [#allocation4]  }
 0x287   :  { %542 = dma.done.wait [#allocation4], 32  }
 0x288   :  { %543 = vsyncadd [#allocation4], 4294967264 }
 0x289   :  { %354 = vsyncpa [#allocation3], 1 }
 0x28a   :  { %355 = vsyncpa [#allocation6], 1 }
 0x28b   :  { %356 = vsyncpa [#allocation9], 1 }
 0x28c   :  { %357 = vsyncpa [#allocation4], 1 }

</bundles_post_ra>
